<compile_context>
chip_gen: v6e
topology: v6e:2x2x1
jax: 0.10.0
libtpu: 0.0.40
codegen_flags: <defaults>
</compile_context>

<pallas_src>
import numpy as np
import jax
import jax.numpy as jnp
from jax import lax
from jax.experimental import pallas as pl
from jax.experimental.pallas import tpu as pltpu


def _round_up(x, m):
    return ((x + m - 1) // m) * m


def group_lasso(fc_weights, fc_bias, coarse_map, lamb=0.01):
    """Pallas equivalent of GroupLasso(dataset, lamb).forward(fc_weights, fc_bias)."""
    N, H = fc_weights.shape
    root_gamma, coarse_gamma, fine_gamma = 2.0 * lamb, 4.0 * lamb, 6.0 * lamb

    # Per-row coefficient from the group structure (static host-side numpy).
    coarse_map = np.asarray(coarse_map)
    in_coarse = (coarse_map >= 0) & (coarse_map < N)
    coef_np = (root_gamma + fine_gamma
               + coarse_gamma * in_coarse.astype(np.float64)).astype(np.float32)

    # ---- Tiling: full-H row stripes, TM rows per grid step (~2 MiB per tile).
    itemsize = jnp.dtype(fc_weights.dtype).itemsize
    bytes_per_row = max(1, H * itemsize)
    target_tile_bytes = 2 << 20
    TM = _round_up(max(1, min(512, target_tile_bytes // bytes_per_row)), 8)
    TM = min(TM, _round_up(N, 8))                 # multiple of 8, >= 8
    G = _round_up(N, TM) // TM                    # number of row blocks

    fold_lanes = (H % 128 == 0)                   # lane-fold only when 128-aligned
    OUT_W = 128 if fold_lanes else H
    need_row_mask = (N % TM != 0)                 # last row block is partial

    # Coefficient column, zero-padded to the tiled row extent (tiny, host-side).
    coef_pad = np.zeros((G * TM, 1), np.float32)
    coef_pad[:N, 0] = coef_np
    coef2d = jnp.asarray(coef_pad)

    def kernel(w_ref, coef_ref, out_ref):
        i = pl.program_id(0)
        w = w_ref[...].astype(jnp.float32)        # (TM, H) native dtype -> f32
        sq = w * w                                # VPU square

        if fold_lanes:
            # Fold lanes to one 128-wide stripe with 128-aligned VPU adds
            # (no relayout, no XLU).
            part = sq[:, 0:128]
            for c in range(128, H, 128):
                part = part + sq[:, c:c + 128]    # (TM, 128)
        else:
            part = sq                             # (TM, H); H stays lane-resident

        if need_row_mask:
            # Zero rows beyond N in the partial last row block (garbage-safe:
            # select, not arithmetic).
            rows = lax.broadcasted_iota(jnp.int32, (TM, 1), 0) + i * TM
            part = jnp.where(rows < N, part, 0.0)

        # Per-row group coefficient (applied before rows get mixed).
        part = part * coef_ref[...]               # (TM, 1) broadcast over lanes

        # Fold sublanes down to one 8-row slab with 8-aligned VPU adds.
        acc = part[0:8, :]
        for r in range(8, TM, 8):
            acc = acc + part[r:r + 8, :]          # (8, OUT_W)

        out_ref[...] = acc                        # each row block owns its output

    cost = pl.CostEstimate(
        flops=3 * N * H,
        transcendentals=0,
        bytes_accessed=(N * H * itemsize          # weight stream (no pad copy)
                        + G * TM * 4              # coefficient column
                        + G * 8 * OUT_W * 4),     # partial output slab
    )

    partial = pl.pallas_call(
        kernel,
        out_shape=jax.ShapeDtypeStruct((G * 8, OUT_W), jnp.float32),
        grid=(G,),
        in_specs=[
            pl.BlockSpec((TM, H), lambda i: (i, 0)),   # contiguous full-H row stripe
            pl.BlockSpec((TM, 1), lambda i: (i, 0)),   # per-row coefficients
        ],
        out_specs=pl.BlockSpec((8, OUT_W), lambda i: (i, 0)),
        compiler_params=pltpu.CompilerParams(
            dimension_semantics=("parallel",),         # row blocks are independent
        ),
        cost_estimate=cost,
    )(fc_weights, coef2d)

    # O(N) bias term + final fold of the tiny partial slab: wrapper-side glue.
    coef_dev = jnp.asarray(coef_np)
    bias_term = jnp.sum(coef_dev * jnp.square(fc_bias.astype(jnp.float32)))
    return jnp.sum(partial) + bias_term


def group_lasso_ref(fc_weights, fc_bias, coarse_map, lamb=0.01):
    """Pure-numpy mirror of the original torch group loop, for verification."""
    fc_weights = np.asarray(fc_weights, np.float64)
    fc_bias = np.asarray(fc_bias, np.float64)
    coarse_map = np.asarray(coarse_map)
    N = len(coarse_map)
    root_gamma, coarse_gamma, fine_gamma = 2.0 * lamb, 4.0 * lamb, 6.0 * lamb
    groups = {root_gamma: [np.arange(N)], coarse_gamma: [], fine_gamma: []}
    for fine in range(N):
        groups[coarse_gamma].append((coarse_map == fine).nonzero()[0])
    for fine in range(N):
        groups[fine_gamma].append(np.array(fine))
    total = 0.0
    for depth in groups:
        for group in groups[depth]:
            total += depth * np.sum(fc_weights[group, :] ** 2)
            total += depth * np.sum(fc_bias[group] ** 2)
    return np.float32(total)


if __name__ == "__main__":
    key = jax.random.PRNGKey(0)
    kw, kb = jax.random.split(key)

    num_fine, hidden = 16, 32
    # 16 fine classes mapped onto 4 coarse classes (the dataset.coarse_map).
    coarse_map = np.repeat(np.arange(4), 4)

    fc_weights = jax.random.normal(kw, (num_fine, hidden), dtype=jnp.float32)
    fc_bias = jax.random.normal(kb, (num_fine,), dtype=jnp.float32)

    out = jax.block_until_ready(group_lasso(fc_weights, fc_bias, coarse_map, lamb=0.01))
    ref = group_lasso_ref(np.asarray(fc_weights), np.asarray(fc_bias), coarse_map, lamb=0.01)

    assert np.allclose(np.asarray(out), ref, rtol=1e-5, atol=1e-5), (out, ref)
    print("KERNEL_OK")
</pallas_src>

<mosaic_0001>
module attributes {stable_mosaic.version = 11 : i64} {
  func.func @kernel(%arg0: i32, %arg1: memref<16x32xf32, #tpu.memory_space<vmem>>, %arg2: memref<16x1xf32, #tpu.memory_space<vmem>>, %arg3: memref<8x32xf32, #tpu.memory_space<vmem>>) attributes {dimension_semantics = [#tpu.dimension_semantics<parallel>], iteration_bounds = array<i64: 1>, scalar_prefetch = 0 : i64, scratch_operands = 0 : i64, tpu.core_type = #tpu.core_type<tc>, window_params = [{transform_indices = @transform_0, window_bounds = array<i64: 16, 32>}, {transform_indices = @transform_1, window_bounds = array<i64: 16, 1>}, {transform_indices = @transform_2, window_bounds = array<i64: 8, 32>}]} {
    %c0 = arith.constant 0 : index
    %c0_0 = arith.constant 0 : index
    %0 = vector.load %arg1[%c0, %c0_0] : memref<16x32xf32, #tpu.memory_space<vmem>>, vector<16x32xf32>
    %1 = arith.mulf %0, %0 : vector<16x32xf32>
    %c0_1 = arith.constant 0 : index
    %c0_2 = arith.constant 0 : index
    %2 = vector.load %arg2[%c0_1, %c0_2] : memref<16x1xf32, #tpu.memory_space<vmem>>, vector<16x1xf32>
    %3 = vector.broadcast %2 : vector<16x1xf32> to vector<16x32xf32>
    %4 = arith.mulf %1, %3 : vector<16x32xf32>
    %5 = vector.extract_strided_slice %4 {offsets = [0, 0], sizes = [8, 32], strides = [1, 1]} : vector<16x32xf32> to vector<8x32xf32>
    %6 = vector.extract_strided_slice %4 {offsets = [8, 0], sizes = [8, 32], strides = [1, 1]} : vector<16x32xf32> to vector<8x32xf32>
    %7 = arith.addf %5, %6 : vector<8x32xf32>
    %c0_3 = arith.constant 0 : index
    %c0_4 = arith.constant 0 : index
    %8 = vector.load %arg3[%c0_3, %c0_4] : memref<8x32xf32, #tpu.memory_space<vmem>>, vector<8x32xf32>
    tpu.vector_store %arg3[%c0_3, %c0_4], %7 {strides = array<i32>} : memref<8x32xf32, #tpu.memory_space<vmem>>, vector<8x32xf32>,
    return
  }
  func.func @transform_0(%arg0: i32) -> (i32, i32) {
    %c0_i32 = arith.constant 0 : i32
    %c0_i32_0 = arith.constant 0 : i32
    return %arg0, %c0_i32 : i32, i32
  }
  func.func @transform_1(%arg0: i32) -> (i32, i32) {
    %c0_i32 = arith.constant 0 : i32
    %c0_i32_0 = arith.constant 0 : i32
    return %arg0, %c0_i32 : i32, i32
  }
  func.func @transform_2(%arg0: i32) -> (i32, i32) {
    %c0_i32 = arith.constant 0 : i32
    %c0_i32_0 = arith.constant 0 : i32
    return %arg0, %c0_i32 : i32, i32
  }
}

</mosaic_0001>

<bundles_post_ra>
// kernel: tpu_custom_call.1
= control target key start
LH: loop header
LB: loop body
LE: loop exit
PB: predicated region body
PF: predicated region fallthrough
CT: control target
= control target key end

     0   :  { %v72_v1 = vmov 0   ;;  %s104_s0 = inlined_call_operand.vmem [shape: f32[16,32], index: 0, kind: input, shape index: {}]   ;;  %s105_s1 = inlined_call_operand.vmem [shape: f32[16,1], index: 1, kind: input, shape index: {}]   ;;  %s106_s2 = inlined_call_operand.hbm [shape: f32[8,32], index: 2, kind: output, shape index: {}]  }
   0x1   :  { %v16_v0 = vld [vmem:[%s105_s1] sm:$0xff]  ;;  %49 = vset.pattern.permute.xlu0 %v72_v1 }
   0x2   :  { %7 = vsyncpa [#allocation3], 0  ;;  %20 = vperm.xlu0 %49, %v16_v0   ;;  %v17_v2 = vld [vmem:[%s105_s1 + $0x8] sm:$0xff]  ;;  %v12_v3 = vld [vmem:[%s104_s0] sm:$0xff]  ;;  %s73_s17 = smov [#allocation2]   ;;  %vm31_vm0 = vcmask 261120  }
   0x3   :  { %v13_v4 = vld [vmem:[%s104_s0 + $0x8] sm:$0xff]  ;;  %v14_v6 = vmul.f32 %v12_v3, %v12_v3  ;;  %s39_s18 = sshll.u32 %s73_s17, 4  ;;  %s40_s18 = int_to_ptr.vmem [resolvable:$true] %s39_s18 }
   0x4   :  { %v15_v7 = vmul.f32 %v13_v4, %v13_v4  ;;  %s50_s1 = scalar_lea.vmem %s40_s18, 128  ;;  %p55_p1 = scmp.lt.s32.totalorder %s40_s18, %s40_s18 }
   0x5   :  { %p51_p0 = scmp.ne.s32.totalorder %s40_s18, %s50_s1  ;;  %p56_p2 = scmp.lt.s32.totalorder %s50_s1, %s50_s1 }
   0x6   :  { %25 = vperm.xlu0 %49, %v17_v2  }
   0x7   :  { %p57_p3 = por %p56_p2, %p55_p1 }
   0x9   :  { %p58_p4 = pnand %p57_p3, %p51_p0 }
  0x7d   :  { %v21_v5 = vpop.permute.xlu0 %20 }
  0x7e   :  { %v28_v9 = vmul.f32 %v21_v5, %v14_v6 }
  0x81   :  { %v26_v8 = vpop.permute.xlu0 %25 }
  0x82   :  { %v29_v10 = vmul.f32 %v26_v8, %v15_v7 }
  0x84   :  { %v30_v11 = vadd.f32 %v29_v10, %v28_v9 }
  0x86   :  { %32 = vst.msk [vmem:[#allocation2] sm:$0xff] %vm31_vm0, %v30_v11 }
  0x87   :  { %61 = shalt.err (!%p58_p4)
}
  0x88   :  { %42 = dma.vmem_to_hbm [thread:$0]  %s40_s18, 128, %s106_s2, [#allocation3]  }
  0x89   :  { %70 = dma.done.wait [#allocation3], 128  }
  0x8a   :  { %71 = vsyncadd [#allocation3], 4294967168 }
  0x8b   :  { %46 = vsyncpa [#allocation3], 1 }

</bundles_post_ra>
